<compile_context>
chip_gen: v5e
topology: v5e:2x2
jax: 0.10.0
libtpu: 0.0.40
codegen_flags: <defaults>
</compile_context>

<pallas_src>
import functools

import jax
import jax.numpy as jnp
from jax.experimental import pallas as pl
from jax.experimental.pallas import tpu as pltpu


def _rmsnorm_q_kernel(x_ref, w_ref, o_ref, *, eps, qmin, qmax):
    # x_ref: (tile_rows, dim) native input dtype   w_ref: (1, dim) float32
    # o_ref: (tile_rows, dim) int8/int16
    x = x_ref[...].astype(jnp.float32)                     # upcast in-register
    variance = jnp.mean(x * x, axis=-1, keepdims=True)     # (tile_rows, 1)
    x_norm = x * jax.lax.rsqrt(variance + eps)             # rsqrt -> EUP slot
    y = w_ref[...] * x_norm                                # broadcast weight
    # round-half-to-even == torch.round; keep f32 for bit-exact match.
    y = jnp.clip(jnp.round(y), qmin, qmax)
    o_ref[...] = y.astype(o_ref.dtype)


_MAX_TILE_ROWS = 1024           # keep several grid steps -> pipelining + megacore
_MIN_ROWS_FOR_CORE_SPLIT = 64   # below this a 2-way split is not worth 0.35us/step


def _vmem_budgets():
    """Return (tile_budget_bytes, vmem_limit_bytes) sized per TPU generation.

    v5e/v6e: 128 MiB VMEM per TensorCore -> large budget so f32 / fat-dim
    shapes still reach the 512+-row tile sweet spot (~85% of HBM roofline).
    v7x: 64 MiB per TC -> conservative budget with headroom.
    """
    cap = 64 * 1024 * 1024  # conservative default (v7x-sized)
    try:
        info = pltpu.get_tpu_info()
        cap = int(getattr(info, "vmem_capacity_bytes", cap))
    except Exception:
        pass
    if cap >= 96 * 1024 * 1024:          # 128-MiB parts (v5e / v6e)
        return 80 * 1024 * 1024, 96 * 1024 * 1024
    return 36 * 1024 * 1024, 48 * 1024 * 1024


def _pick_tile_rows(rows, dim, in_bytes, out_bytes, tile_budget):
    """Largest row tile (multiple of 32, <= _MAX_TILE_ROWS) whose
    double-buffered input+output tiles PLUS the single-buffered f32
    intermediates (upcast x and x_norm/y) fit the VMEM tile budget."""
    per_row = dim * (2 * (in_bytes + out_bytes)   # double-buffered in + out
                     + 2 * 4)                     # f32 x + f32 x_norm/y scratch
    tm = tile_budget // max(per_row, 1)
    tm = min(_MAX_TILE_ROWS, tm)
    tm = max(32, (tm // 32) * 32)
    if rows > tm:
        return tm
    # rows fit in a single block: still force >= 2 grid steps for medium
    # shapes so both v7x TensorCores (sharing 3.2 TB/s HBM) get work.
    if rows > _MIN_ROWS_FOR_CORE_SPLIT:
        half = -(-rows // 2)
        half = ((half + 31) // 32) * 32
        return min(tm, half)
    return rows                                   # tiny shape: one block


def rmsnorm_q(x, weight, *, eps=1e-6, bits=8):
    """RMSNorm + symmetric integer quantization (torch RMSNormQ.forward).

    x:      (..., dim) float array (any float dtype; upcast to f32 in-kernel)
    weight: (dim,) float array (cast to float32, matching the torch buffer)
    returns int8 (bits=8) or int16 (bits=16) array with x's shape.
    """
    if bits == 8:
        q_dtype = jnp.int8
    elif bits == 16:
        q_dtype = jnp.int16
    else:
        raise ValueError(f"Quan bits {bits} is not supported!")
    qmin = -(2 ** (bits - 1))
    qmax = 2 ** (bits - 1) - 1

    orig_shape = x.shape
    dim = orig_shape[-1]
    # NOTE: lane-dense stores want dim % 128 == 0 (true for typical hidden
    # sizes). Non-multiples still work (full-dim block) but use masked stores.
    x2d = x.reshape(-1, dim)                      # stream native dtype, no f32 copy
    rows = x2d.shape[0]
    w2d = weight.reshape(1, dim).astype(jnp.float32)

    in_bytes = jnp.dtype(x2d.dtype).itemsize
    out_bytes = jnp.dtype(q_dtype).itemsize
    tile_budget, vmem_limit = _vmem_budgets()
    tm = _pick_tile_rows(rows, dim, in_bytes, out_bytes, tile_budget)
    grid = (pl.cdiv(rows, tm),)

    kernel = functools.partial(_rmsnorm_q_kernel, eps=eps, qmin=qmin, qmax=qmax)

    # Pure HBM-streaming op: tell XLA's scheduler what it actually costs.
    cost = pl.CostEstimate(
        flops=4 * rows * dim,
        transcendentals=rows,
        bytes_accessed=rows * dim * (in_bytes + out_bytes) + dim * 4,
    )

    out2d = pl.pallas_call(
        kernel,
        out_shape=jax.ShapeDtypeStruct((rows, dim), q_dtype),
        grid_spec=pltpu.PrefetchScalarGridSpec(
            num_scalar_prefetch=0,
            grid=grid,
            in_specs=[
                pl.BlockSpec((tm, dim), lambda i: (i, 0)),
                # constant index_map -> weight stays resident, DMA'd once
                pl.BlockSpec((1, dim), lambda i: (0, 0)),
            ],
            out_specs=pl.BlockSpec((tm, dim), lambda i: (i, 0)),
        ),
        compiler_params=pltpu.CompilerParams(
            dimension_semantics=("parallel",),
            vmem_limit_bytes=vmem_limit,
        ),
        cost_estimate=cost,
    )(x2d, w2d)

    return out2d.reshape(orig_shape)


if __name__ == "__main__":
    key = jax.random.PRNGKey(0)
    batch, seq, hidden = 2, 8, 128

    # module __init__: weight = ones(dim, float32)  (deterministic)
    weight = jnp.ones((hidden,), dtype=jnp.float32)

    # deterministic input, scaled so quantization exercises round + clamp
    x = 3.0 * jax.random.normal(key, (batch, seq, hidden), dtype=jnp.float32)

    out = rmsnorm_q(x, weight, eps=1e-6, bits=8)
    out = jax.block_until_ready(out)

    # pure-JAX reference of the torch forward
    xf = x.astype(jnp.float32)
    var = jnp.mean(xf * xf, axis=-1, keepdims=True)
    ref = weight * (xf * jax.lax.rsqrt(var + 1e-6))
    ref8 = jnp.clip(jnp.round(ref), -128, 127).astype(jnp.int8)
    assert out.shape == (batch, seq, hidden) and out.dtype == jnp.int8
    assert bool(jnp.all(out == ref8))

    # native-bf16 streaming path (upcast happens in-kernel)
    out_bf16 = jax.block_until_ready(
        rmsnorm_q(x.astype(jnp.bfloat16), weight, eps=1e-6, bits=8))
    assert out_bf16.shape == (batch, seq, hidden) and out_bf16.dtype == jnp.int8

    # int16 quantization path
    out_i16 = jax.block_until_ready(rmsnorm_q(x, weight, eps=1e-6, bits=16))
    ref16 = jnp.clip(jnp.round(ref), -32768, 32767).astype(jnp.int16)
    assert out_i16.dtype == jnp.int16
    assert bool(jnp.all(out_i16 == ref16))

    print("KERNEL_OK")
</pallas_src>

<mosaic_0001>
module attributes {stable_mosaic.version = 11 : i64} {
  func.func @_rmsnorm_q_kernel(%arg0: i32, %arg1: memref<16x128xf32, #tpu.memory_space<vmem>>, %arg2: memref<1x128xf32, #tpu.memory_space<vmem>>, %arg3: memref<16x128xi8, #tpu.memory_space<vmem>>) attributes {dimension_semantics = [#tpu.dimension_semantics<parallel>], iteration_bounds = array<i64: 1>, scalar_prefetch = 0 : i64, scratch_operands = 0 : i64, tpu.core_type = #tpu.core_type<tc>, window_params = [{transform_indices = @transform_0, window_bounds = array<i64: 16, 128>}, {pipeline_mode = #tpu.pipeline_mode<synchronous>, transform_indices = @transform_1, window_bounds = array<i64: 1, 128>}, {transform_indices = @transform_2, window_bounds = array<i64: 16, 128>}]} {
    %c0 = arith.constant 0 : index
    %c0_0 = arith.constant 0 : index
    %0 = vector.load %arg1[%c0, %c0_0] : memref<16x128xf32, #tpu.memory_space<vmem>>, vector<16x128xf32>
    %1 = arith.mulf %0, %0 : vector<16x128xf32>
    %cst = arith.constant dense<0.000000e+00> : vector<16xf32>
    %2 = vector.multi_reduction <add>, %1, %cst [1] : vector<16x128xf32> to vector<16xf32>
    %3 = vector.shape_cast %2 : vector<16xf32> to vector<16x1xf32>
    %cst_1 = arith.constant 1.280000e+02 : f32
    %4 = vector.broadcast %cst_1 : f32 to vector<16x1xf32>
    %5 = arith.divf %3, %4 : vector<16x1xf32>
    %cst_2 = arith.constant 9.99999997E-7 : f32
    %6 = vector.broadcast %cst_2 : f32 to vector<16x1xf32>
    %7 = arith.addf %5, %6 : vector<16x1xf32>
    %8 = math.rsqrt %7 : vector<16x1xf32>
    %9 = vector.broadcast %8 : vector<16x1xf32> to vector<16x128xf32>
    %10 = arith.mulf %0, %9 : vector<16x128xf32>
    %c0_3 = arith.constant 0 : index
    %c0_4 = arith.constant 0 : index
    %11 = vector.load %arg2[%c0_3, %c0_4] : memref<1x128xf32, #tpu.memory_space<vmem>>, vector<1x128xf32>
    %12 = vector.broadcast %11 : vector<1x128xf32> to vector<16x128xf32>
    %13 = arith.mulf %12, %10 : vector<16x128xf32>
    %14 = math.roundeven %13 : vector<16x128xf32>
    %c-128_i32 = arith.constant -128 : i32
    %c127_i32 = arith.constant 127 : i32
    %15 = arith.sitofp %c-128_i32 : i32 to f32
    %16 = vector.broadcast %15 : f32 to vector<16x128xf32>
    %17 = arith.maximumf %16, %14 : vector<16x128xf32>
    %18 = arith.sitofp %c127_i32 : i32 to f32
    %19 = vector.broadcast %18 : f32 to vector<16x128xf32>
    %20 = arith.minimumf %19, %17 : vector<16x128xf32>
    %21 = arith.fptosi %20 : vector<16x128xf32> to vector<16x128xi8>
    %c0_5 = arith.constant 0 : index
    %c0_6 = arith.constant 0 : index
    %22 = vector.load %arg3[%c0_5, %c0_6] : memref<16x128xi8, #tpu.memory_space<vmem>>, vector<16x128xi8>
    tpu.vector_store %arg3[%c0_5, %c0_6], %21 {strides = array<i32>} : memref<16x128xi8, #tpu.memory_space<vmem>>, vector<16x128xi8>,
    return
  }
  func.func @transform_0(%arg0: i32) -> (i32, i32) {
    %c0_i32 = arith.constant 0 : i32
    %c0_i32_0 = arith.constant 0 : i32
    return %arg0, %c0_i32 : i32, i32
  }
  func.func @transform_1(%arg0: i32) -> (i32, i32) {
    %c0_i32 = arith.constant 0 : i32
    %c0_i32_0 = arith.constant 0 : i32
    %c0_i32_1 = arith.constant 0 : i32
    return %c0_i32, %c0_i32_0 : i32, i32
  }
  func.func @transform_2(%arg0: i32) -> (i32, i32) {
    %c0_i32 = arith.constant 0 : i32
    %c0_i32_0 = arith.constant 0 : i32
    return %arg0, %c0_i32 : i32, i32
  }
}

</mosaic_0001>

<bundles_post_ra>
// kernel: tpu_custom_call.1
= control target key start
LH: loop header
LB: loop body
LE: loop exit
PB: predicated region body
PF: predicated region fallthrough
CT: control target
= control target key end

     0   :  { %7 = vsyncpa [#allocation3], 0  ;;  %s268_s0 = inlined_call_operand.hbm [shape: f32[16,128], index: 0, kind: input, shape index: {}]   ;;  %s269_s1 = inlined_call_operand.hbm [shape: f32[1,128], index: 1, kind: input, shape index: {}]   ;;  %s270_s2 = inlined_call_operand.hbm [shape: s8[16,128], index: 2, kind: output, shape index: {}]  }
   0x1   :  { %8 = vsyncpa [#allocation6], 0 }
   0x2   :  { %9 = vsyncpa [#allocation4], 0  ;;  %s14_s11 = sshll.u32 %s268_s0, 4  ;;  %s236_s12 = smov [#allocation2]   ;;  %s15_s11 = int_to_ptr.hbm [resolvable:$true] %s14_s11 }
   0x3   :  { %s16_s13 = sshll.u32 %s236_s12, 4  ;;  %s28_s16 = sshll.u32 %s269_s1, 4  ;;  %s17_s13 = int_to_ptr.vmem [resolvable:$true] %s16_s13  ;;  %s29_s16 = int_to_ptr.hbm [resolvable:$true] %s28_s16 }
   0x4   :  { %s237_s17 = smov 128   ;;  %s238_s18 = smov 8  }
   0x5   :  { %22 = dma.hbm_to_vmem [thread:$0]  %s15_s11, 256, %s17_s13, [#allocation3], %s237_s17, %s237_s17, %s238_s18  }
   0x6   :  { %s239_s19 = smov [#allocation5]  }
   0x7   :  { %s30_s20 = sshll.u32 %s239_s19, 4  ;;  %s31_s20 = int_to_ptr.vmem [resolvable:$true] %s30_s20 }
   0x8   :  { %33 = dma.hbm_to_vmem [thread:$0]  %s29_s16, 16, %s31_s20, [#allocation6]  }
   0x9   :  { %230 = dma.done.wait [#allocation3], 256  }
   0xa   :  { %231 = vsyncadd [#allocation3], 4294967040 }
   0xb   :  { %232 = dma.done.wait [#allocation6], 16  }
   0xc   :  { %233 = vsyncadd [#allocation6], 4294967280  ;;  %v42_v0 = vld [vmem:[#allocation2] sm:$0xff]  ;;  %v43_v2 = vld [vmem:[#allocation2 + $0x8] sm:$0xff]  ;;  %v240_v4 = vmov 128.0   ;;  %s241_s0 = smov [#allocation7]  }
   0xd   :  { %v44_v1 = vmul.f32 %v42_v0, %v42_v0  ;;  %v45_v3 = vmul.f32 %v43_v2, %v43_v2  ;;  %152 = vrcp.f32 %v240_v4  ;;  %v151_v25 = vld [vmem:[#allocation5] ss:$0 sm:$0xff]  ;;  %s111_s1 = sshll.u32 %s241_s0, 4  ;;  %s113_s23 = sshll.u32 %s270_s2, 4  ;;  %s112_s1 = int_to_ptr.vmem [resolvable:$true] %s111_s1  ;;  %s114_s23 = int_to_ptr.hbm [resolvable:$true] %s113_s23 }
   0xe   :  { %s242_s24 = smov 32   ;;  %s243_s25 = smov 2  }
   0xf   :  { %46 = vadd.xlane.f32.xlu0 %v44_v1 }
  0x13   :  { %v153_v5 = vpop.eup %152 }
  0x14   :  { %v51_v6 = vmul.f32 128.0, %v153_v5  ;;  %vm55_vm0 = vweird.f32 %v153_v5 }
  0x16   :  { %v52_v7 = vsub.f32 1.0, %v51_v6 }
  0x17   :  { %48 = vadd.xlane.f32.xlu0 %v45_v3 }
  0x18   :  { %v53_v8 = vmul.f32 %v153_v5, %v52_v7 }
  0x1a   :  { %v54_v9 = vadd.f32 %v153_v5, %v53_v8 }
  0x1c   :  { %v56_v10 = vsel %vm55_vm0, %v153_v5, %v54_v9 }
  0x82   :  { %v47_v11 = vpop.xlane.xlu0 %46 }
  0x83   :  { %v57_v12 = vmul.f32 %v56_v10, %v47_v11 }
  0x85   :  { %v59_v13 = vadd.f32 1e-06, %v57_v12 }
  0x87   :  { %154 = vrsqrt.f32 %v59_v13  ;;  %vm67_vm2 = vweird.f32 %v59_v13 }
  0x8a   :  { %v49_v14 = vpop.xlane.xlu0 %48 }
  0x8b   :  { %v58_v15 = vmul.f32 %v56_v10, %v49_v14 }
  0x8d   :  { %v155_v16 = vpop.eup %154  ;;  %v60_v17 = vadd.f32 1e-06, %v58_v15 }
  0x8e   :  { %v62_v18 = vmul.f32 %v155_v16, %v59_v13  ;;  %vm68_vm1 = vweird.f32 %v155_v16 }
  0x8f   :  { %156 = vrsqrt.f32 %v60_v17  ;;  %vm69_vm3 = vmor %vm67_vm2, %vm68_vm1  ;;  %vm77_vm5 = vweird.f32 %v60_v17 }
  0x90   :  { %v63_v19 = vmul.f32 %v155_v16, %v62_v18 }
  0x92   :  { %v64_v20 = vmul.f32 0.5, %v63_v19 }
  0x94   :  { %v65_v21 = vsub.f32 1.5, %v64_v20 }
  0x95   :  { %v157_v22 = vpop.eup %156 }
  0x96   :  { %v66_v23 = vmul.f32 %v155_v16, %v65_v21  ;;  %v72_v24 = vmul.f32 %v157_v22, %v60_v17  ;;  %vm78_vm4 = vweird.f32 %v157_v22 }
  0x97   :  { %vm79_vm6 = vmor %vm77_vm5, %vm78_vm4 }
  0x98   :  { %v70_v26 = vsel %vm69_vm3, %v155_v16, %v66_v23  ;;  %v73_v27 = vmul.f32 %v157_v22, %v72_v24 }
  0x99   :  { %v81_v28 = vmul.f32 %v70_v26, %v42_v0 }
  0x9a   :  { %v74_v29 = vmul.f32 0.5, %v73_v27 }
  0x9b   :  { %v87_v30 = vmul.f32 %v151_v25, %v81_v28 }
  0x9c   :  { %v75_v31 = vsub.f32 1.5, %v74_v29 }
  0x9d   :  { %v131_v32 = vmax.f32 %v87_v30, -128.0 }
  0x9e   :  { %v76_v33 = vmul.f32 %v157_v22, %v75_v31 }
  0x9f   :  { %v132_v34 = vmin.f32 %v131_v32, 127.0 }
  0xa0   :  { %v80_v35 = vsel %vm79_vm6, %v157_v22, %v76_v33 }
  0xa1   :  { %v139_v36 = vcvt.f32.s32 %v132_v34  ;;  %v82_v37 = vmul.f32 %v80_v35, %v43_v2 }
  0xa3   :  { %v101_v38 = vpack.c.b16 %v139_v36, %v139_v36  ;;  %v88_v39 = vmul.f32 %v151_v25, %v82_v37 }
  0xa5   :  { %v134_v40 = vmax.f32 %v88_v39, -128.0  ;;  %v102_v41 = vpack.c.b8 %v101_v38, %v101_v38 }
  0xa7   :  { %v135_v42 = vmin.f32 %v134_v40, 127.0  ;;  %105 = vst [vmem:[#allocation7] sm:$0x3] %v102_v41 }
  0xa9   :  { %v142_v43 = vcvt.f32.s32 %v135_v42 }
  0xab   :  { %v103_v44 = vpack.c.b16 %v142_v43, %v142_v43 }
  0xad   :  { %v104_v45 = vpack.c.b8 %v103_v44, %v103_v44 }
  0xaf   :  { %106 = vst [vmem:[#allocation7 + $0x2] sm:$0x3] %v104_v45 }
  0xb0   :  { %119 = dma.vmem_to_hbm [thread:$0]  %s112_s1, 64, %s114_s23, [#allocation4], %s242_s24, %s242_s24, %s243_s25  }
  0xb1   :  { %234 = dma.done.wait [#allocation4], 64  }
  0xb2   :  { %235 = vsyncadd [#allocation4], 4294967232 }
  0xb3   :  { %124 = vsyncpa [#allocation3], 1 }
  0xb4   :  { %125 = vsyncpa [#allocation6], 1 }
  0xb5   :  { %126 = vsyncpa [#allocation4], 1 }

</bundles_post_ra>
